<compile_context>
chip_gen: v6e
topology: v6e:2x2x1
jax: 0.10.0
libtpu: 0.0.40
codegen_flags: <defaults>
</compile_context>

<pallas_src>
import functools

import numpy as np
import jax
import jax.numpy as jnp
from jax.experimental import pallas as pl
from jax.experimental.pallas import tpu as pltpu


# ---------------------------------------------------------------------------
# Noise schedule (glue, computed once on host; mirrors make_beta_schedule)
# ---------------------------------------------------------------------------
def make_sqrt_alphas_cumprod(n_timestep, linear_start=1e-4, linear_end=2e-2):
    betas = np.linspace(linear_start, linear_end, n_timestep, dtype=np.float64)
    alphas_cumprod = np.cumprod(1.0 - betas, axis=0)
    return jnp.asarray(np.sqrt(alphas_cumprod), dtype=jnp.float32)


def _pick_lane_tile(n128, cap):
    """Largest multiple of 128 that divides n128 (itself a multiple of 128)
    and is <= cap. Always succeeds (128 divides n128)."""
    cap = max(128, cap - (cap % 128))
    for tn in range(min(cap, n128), 127, -128):
        if n128 % tn == 0:
            return tn
    return 128


# ---------------------------------------------------------------------------
# Pallas kernel: q_sample + synthetic denoise_fn (1x1 conv) + partial L1 sum
# grid = (B, num_lane_tiles)  -- both "parallel"; each step owns one output
# (8,128) partial-sum block.
# ---------------------------------------------------------------------------
def _tfs_diffusion_kernel(coef_ref,                     # SMEM (3, B): a, sigma, t/T
                          w_sr_ref, w_ns_ref, bias_ref,  # VMEM (C,C),(C,C),(C,1)
                          sr_ref, hr_ref, nz_ref,        # VMEM (C, TN) each
                          out_ref,                       # VMEM (8, 128) partial sum
                          *, hw_valid, needs_mask):
    b = pl.program_id(0)
    a = coef_ref[0, b]          # sqrt_alphas_cumprod[t_b]
    sigma = coef_ref[1, b]      # sqrt(1 - a^2)   (precomputed in wrapper)
    tc = coef_ref[2, b]         # t_b / num_timesteps

    sr = sr_ref[...].astype(jnp.float32)   # (C, TN)
    hr = hr_ref[...].astype(jnp.float32)
    nz = nz_ref[...].astype(jnp.float32)

    # q_sample at full (C, TN) sublane density (scalar broadcasts).
    x_noisy = a * hr + sigma * nz

    # denoise_fn(cat([sr, x_noisy], channel), t): 1x1 conv over 2C channels.
    # Tiny channel contraction goes to the otherwise-idle MXU.
    pre = (jnp.dot(w_sr_ref[...], sr, preferred_element_type=jnp.float32)
           + jnp.dot(w_ns_ref[...], x_noisy, preferred_element_type=jnp.float32)
           + bias_ref[...] + tc)
    err = jnp.abs(nz - jnp.tanh(pre))                     # (C, TN)

    if needs_mask:   # static (trace-time) flag: only when H*W % 128 != 0
        tn = err.shape[1]
        col = (pl.program_id(1) * tn
               + jax.lax.broadcasted_iota(jnp.int32, err.shape, 1))
        err = jnp.where(col < hw_valid, err, 0.0)

    out_ref[...] = jnp.full(out_ref.shape, jnp.sum(err), dtype=jnp.float32)


def tfs_diffusion_forward(hr, sr_123, noise, t, sqrt_alphas_cumprod,
                          num_timesteps, w_sr, w_noisy, bias,
                          *, storage_dtype=jnp.float32,
                          max_lane_tile=16384,
                          vmem_limit_bytes=32 * 1024 * 1024):
    """hr, sr_123, noise: NCHW; t: (B,) int32. Returns scalar L1-sum loss.

    storage_dtype=jnp.bfloat16 halves HBM traffic (useful on bandwidth-poor
    v5e); compute is always f32 inside the kernel.
    """
    B, C, H, W = hr.shape
    HW = H * W
    HWp = ((HW + 127) // 128) * 128           # lane-pad to a multiple of 128
    TN = _pick_lane_tile(HWp, max_lane_tile)
    num_tiles = HWp // TN
    needs_mask = (HWp != HW)

    # Free reshape to (B, C, H*W): NCHW is already channel-major per batch
    # element, so this moves no data. Only the (rare) ragged tail gets padded.
    def prep(x):
        x = x.reshape(B, C, HW)
        if x.dtype != storage_dtype:
            x = x.astype(storage_dtype)
        if needs_mask:
            x = jnp.pad(x, ((0, 0), (0, 0), (0, HWp - HW)))
        return x

    sr_t, hr_t, nz_t = prep(sr_123), prep(hr), prep(noise)

    # Per-batch scalars, shipped once as a tiny (3, B) SMEM table.
    alpha = sqrt_alphas_cumprod[t].astype(jnp.float32)                 # (B,)
    sigma = jnp.sqrt(jnp.maximum(1.0 - alpha * alpha, 0.0))            # (B,)
    tcond = t.astype(jnp.float32) / float(num_timesteps)               # (B,)
    coef = jnp.stack([alpha, sigma, tcond], axis=0)                    # (3, B)

    kernel = functools.partial(_tfs_diffusion_kernel,
                               hw_valid=HW, needs_mask=needs_mask)

    partials = pl.pallas_call(
        kernel,
        out_shape=jax.ShapeDtypeStruct((B, num_tiles, 8, 128), jnp.float32),
        grid=(B, num_tiles),
        in_specs=[
            pl.BlockSpec(memory_space=pltpu.MemorySpace.SMEM),           # coef (3,B)
            pl.BlockSpec((C, C), lambda b, i: (0, 0)),                   # w_sr
            pl.BlockSpec((C, C), lambda b, i: (0, 0)),                   # w_noisy
            pl.BlockSpec((C, 1), lambda b, i: (0, 0)),                   # bias
            pl.BlockSpec((pl.Squeezed(), C, TN), lambda b, i: (b, 0, i)),  # sr
            pl.BlockSpec((pl.Squeezed(), C, TN), lambda b, i: (b, 0, i)),  # hr
            pl.BlockSpec((pl.Squeezed(), C, TN), lambda b, i: (b, 0, i)),  # noise
        ],
        out_specs=pl.BlockSpec((pl.Squeezed(), pl.Squeezed(), 8, 128),
                               lambda b, i: (b, i, 0, 0)),
        compiler_params=pltpu.CompilerParams(
            dimension_semantics=("parallel", "parallel"),
            vmem_limit_bytes=vmem_limit_bytes),
    )(coef, w_sr, w_noisy, bias, sr_t, hr_t, nz_t)

    return jnp.sum(partials[:, :, 0, 0])


# ---------------------------------------------------------------------------
# Pure-JAX reference (for a sanity check)
# ---------------------------------------------------------------------------
def reference_forward(hr, sr_123, noise, t, sqrt_alphas_cumprod,
                      num_timesteps, w_sr, w_noisy, bias):
    B, C, H, W = hr.shape
    a = sqrt_alphas_cumprod[t].reshape(B, 1, 1, 1)
    tc = (t.astype(jnp.float32) / float(num_timesteps)).reshape(B, 1, 1, 1)
    x_noisy = a * hr + jnp.sqrt(jnp.maximum(1.0 - a * a, 0.0)) * noise
    pre = (jnp.einsum('oc,bchw->bohw', w_sr, sr_123)
           + jnp.einsum('oc,bchw->bohw', w_noisy, x_noisy)
           + bias.reshape(1, C, 1, 1) + tc)
    x_recon = jnp.tanh(pre)
    return jnp.sum(jnp.abs(noise - x_recon))


if __name__ == "__main__":
    B, C, H, W = 2, 4, 16, 16
    NUM_TIMESTEPS = 100

    key = jax.random.PRNGKey(0)
    k1, k2, k3, k4, k5, k6, k7 = jax.random.split(key, 7)

    hr     = jax.random.normal(k1, (B, C, H, W), jnp.float32)   # x['HR']
    sr_123 = jax.random.normal(k2, (B, C, H, W), jnp.float32)   # x['1_2_3_SR']
    noise  = jax.random.normal(k3, (B, C, H, W), jnp.float32)
    t      = jax.random.randint(k4, (B,), 0, NUM_TIMESTEPS, jnp.int32)

    # deterministic synthetic denoise_fn parameters (1x1 conv over 2C channels)
    w_sr    = 0.2 * jax.random.normal(k5, (C, C), jnp.float32)
    w_noisy = 0.2 * jax.random.normal(k6, (C, C), jnp.float32)
    bias    = 0.1 * jax.random.normal(k7, (C, 1), jnp.float32)

    sqrt_alphas_cumprod = make_sqrt_alphas_cumprod(NUM_TIMESTEPS)

    out = tfs_diffusion_forward(hr, sr_123, noise, t, sqrt_alphas_cumprod,
                                NUM_TIMESTEPS, w_sr, w_noisy, bias)
    out = jax.block_until_ready(out)

    ref = reference_forward(hr, sr_123, noise, t, sqrt_alphas_cumprod,
                            NUM_TIMESTEPS, w_sr, w_noisy, bias)
    ref = jax.block_until_ready(ref)

    assert np.isfinite(float(out)), "non-finite loss"
    np.testing.assert_allclose(float(out), float(ref), rtol=2e-2)

    print("KERNEL_OK")
</pallas_src>

<mosaic_0001>
module attributes {stable_mosaic.version = 11 : i64} {
  func.func @_tfs_diffusion_kernel(%arg0: i32, %arg1: i32, %arg2: memref<3x2xf32, #tpu.memory_space<smem>>, %arg3: memref<4x4xf32, #tpu.memory_space<vmem>>, %arg4: memref<4x4xf32, #tpu.memory_space<vmem>>, %arg5: memref<4x1xf32, #tpu.memory_space<vmem>>, %arg6: memref<1x4x256xf32, #tpu.memory_space<vmem>>, %arg7: memref<1x4x256xf32, #tpu.memory_space<vmem>>, %arg8: memref<1x4x256xf32, #tpu.memory_space<vmem>>, %arg9: memref<1x1x8x128xf32, #tpu.memory_space<vmem>>) attributes {dimension_semantics = [#tpu.dimension_semantics<parallel>, #tpu.dimension_semantics<parallel>], iteration_bounds = array<i64: 2, 1>, scalar_prefetch = 0 : i64, scratch_operands = 0 : i64, tpu.core_type = #tpu.core_type<tc>, window_params = [{transform_indices = @transform_0, window_bounds = array<i64: 3, 2>}, {pipeline_mode = #tpu.pipeline_mode<synchronous>, transform_indices = @transform_1, window_bounds = array<i64: 4, 4>}, {pipeline_mode = #tpu.pipeline_mode<synchronous>, transform_indices = @transform_2, window_bounds = array<i64: 4, 4>}, {pipeline_mode = #tpu.pipeline_mode<synchronous>, transform_indices = @transform_3, window_bounds = array<i64: 4, 1>}, {transform_indices = @transform_4, window_bounds = array<i64: 1, 4, 256>}, {transform_indices = @transform_5, window_bounds = array<i64: 1, 4, 256>}, {transform_indices = @transform_6, window_bounds = array<i64: 1, 4, 256>}, {transform_indices = @transform_7, window_bounds = array<i64: 1, 1, 8, 128>}]} {
    %c0 = arith.constant 0 : index
    %0 = arith.index_cast %arg0 : i32 to index
    %1 = memref.load %arg2[%c0, %0] : memref<3x2xf32, #tpu.memory_space<smem>>
    %c1 = arith.constant 1 : index
    %2 = arith.index_cast %arg0 : i32 to index
    %3 = memref.load %arg2[%c1, %2] : memref<3x2xf32, #tpu.memory_space<smem>>
    %c2 = arith.constant 2 : index
    %4 = arith.index_cast %arg0 : i32 to index
    %5 = memref.load %arg2[%c2, %4] : memref<3x2xf32, #tpu.memory_space<smem>>
    %c0_0 = arith.constant 0 : index
    %c0_1 = arith.constant 0 : index
    %c0_2 = arith.constant 0 : index
    %6 = vector.load %arg6[%c0_0, %c0_1, %c0_2] : memref<1x4x256xf32, #tpu.memory_space<vmem>>, vector<1x4x256xf32>
    %7 = vector.shape_cast %6 : vector<1x4x256xf32> to vector<4x256xf32>
    %c0_3 = arith.constant 0 : index
    %c0_4 = arith.constant 0 : index
    %c0_5 = arith.constant 0 : index
    %8 = vector.load %arg7[%c0_3, %c0_4, %c0_5] : memref<1x4x256xf32, #tpu.memory_space<vmem>>, vector<1x4x256xf32>
    %9 = vector.shape_cast %8 : vector<1x4x256xf32> to vector<4x256xf32>
    %c0_6 = arith.constant 0 : index
    %c0_7 = arith.constant 0 : index
    %c0_8 = arith.constant 0 : index
    %10 = vector.load %arg8[%c0_6, %c0_7, %c0_8] : memref<1x4x256xf32, #tpu.memory_space<vmem>>, vector<1x4x256xf32>
    %11 = vector.shape_cast %10 : vector<1x4x256xf32> to vector<4x256xf32>
    %12 = vector.broadcast %1 : f32 to vector<4x256xf32>
    %13 = arith.mulf %12, %9 : vector<4x256xf32>
    %14 = vector.broadcast %3 : f32 to vector<4x256xf32>
    %15 = arith.mulf %14, %11 : vector<4x256xf32>
    %16 = arith.addf %13, %15 : vector<4x256xf32>
    %c0_9 = arith.constant 0 : index
    %c0_10 = arith.constant 0 : index
    %17 = vector.load %arg3[%c0_9, %c0_10] : memref<4x4xf32, #tpu.memory_space<vmem>>, vector<4x4xf32>
    %cst = arith.constant dense<0.000000e+00> : vector<4x256xf32>
    %18 = tpu.matmul %17, %7, %cst {dimension_numbers = #tpu.dot_dimension_numbers<[1], [0], [0], [1], [0, 0, 1, 1], [], []>} : vector<4x4xf32>, vector<4x256xf32>, vector<4x256xf32> -> vector<4x256xf32>
    %c0_11 = arith.constant 0 : index
    %c0_12 = arith.constant 0 : index
    %19 = vector.load %arg4[%c0_11, %c0_12] : memref<4x4xf32, #tpu.memory_space<vmem>>, vector<4x4xf32>
    %cst_13 = arith.constant dense<0.000000e+00> : vector<4x256xf32>
    %20 = tpu.matmul %19, %16, %cst_13 {dimension_numbers = #tpu.dot_dimension_numbers<[1], [0], [0], [1], [0, 0, 1, 1], [], []>} : vector<4x4xf32>, vector<4x256xf32>, vector<4x256xf32> -> vector<4x256xf32>
    %21 = arith.addf %18, %20 : vector<4x256xf32>
    %c0_14 = arith.constant 0 : index
    %c0_15 = arith.constant 0 : index
    %22 = vector.load %arg5[%c0_14, %c0_15] : memref<4x1xf32, #tpu.memory_space<vmem>>, vector<4x1xf32>
    %23 = vector.broadcast %22 : vector<4x1xf32> to vector<4x256xf32>
    %24 = arith.addf %21, %23 : vector<4x256xf32>
    %25 = vector.broadcast %5 : f32 to vector<4x256xf32>
    %26 = arith.addf %24, %25 : vector<4x256xf32>
    %27 = math.tanh %26 : vector<4x256xf32>
    %28 = arith.subf %11, %27 : vector<4x256xf32>
    %29 = math.absf %28 : vector<4x256xf32>
    %30 = vector.shape_cast %29 : vector<4x256xf32> to vector<1x4x256xf32>
    %cst_16 = arith.constant dense<0.000000e+00> : vector<1xf32>
    %31 = vector.multi_reduction <add>, %30, %cst_16 [1, 2] : vector<1x4x256xf32> to vector<1xf32>
    %32 = vector.shape_cast %31 : vector<1xf32> to vector<1x1x1xf32>
    %33 = vector.extract %32[0, 0, 0] : f32 from vector<1x1x1xf32>
    %34 = vector.broadcast %33 : f32 to vector<8x128xf32>
    %c0_17 = arith.constant 0 : index
    %c0_18 = arith.constant 0 : index
    %c0_19 = arith.constant 0 : index
    %c0_20 = arith.constant 0 : index
    %35 = vector.load %arg9[%c0_17, %c0_18, %c0_19, %c0_20] : memref<1x1x8x128xf32, #tpu.memory_space<vmem>>, vector<1x1x8x128xf32>
    %36 = vector.shape_cast %35 : vector<1x1x8x128xf32> to vector<8x128xf32>
    %37 = vector.shape_cast %34 : vector<8x128xf32> to vector<1x1x8x128xf32>
    tpu.vector_store %arg9[%c0_17, %c0_18, %c0_19, %c0_20], %37 {strides = array<i32>} : memref<1x1x8x128xf32, #tpu.memory_space<vmem>>, vector<1x1x8x128xf32>,
    return
  }
  func.func @transform_0(%arg0: i32, %arg1: i32) -> (i32, i32) {
    %c0_i32 = arith.constant 0 : i32
    %c0_i32_0 = arith.constant 0 : i32
    %c0_i32_1 = arith.constant 0 : i32
    return %c0_i32, %c0_i32_0 : i32, i32
  }
  func.func @transform_1(%arg0: i32, %arg1: i32) -> (i32, i32) {
    %c0_i32 = arith.constant 0 : i32
    %c0_i32_0 = arith.constant 0 : i32
    %c0_i32_1 = arith.constant 0 : i32
    return %c0_i32, %c0_i32_0 : i32, i32
  }
  func.func @transform_2(%arg0: i32, %arg1: i32) -> (i32, i32) {
    %c0_i32 = arith.constant 0 : i32
    %c0_i32_0 = arith.constant 0 : i32
    %c0_i32_1 = arith.constant 0 : i32
    return %c0_i32, %c0_i32_0 : i32, i32
  }
  func.func @transform_3(%arg0: i32, %arg1: i32) -> (i32, i32) {
    %c0_i32 = arith.constant 0 : i32
    %c0_i32_0 = arith.constant 0 : i32
    %c0_i32_1 = arith.constant 0 : i32
    return %c0_i32, %c0_i32_0 : i32, i32
  }
  func.func @transform_4(%arg0: i32, %arg1: i32) -> (i32, i32, i32) {
    %c0_i32 = arith.constant 0 : i32
    %c0_i32_0 = arith.constant 0 : i32
    return %arg0, %c0_i32, %arg1 : i32, i32, i32
  }
  func.func @transform_5(%arg0: i32, %arg1: i32) -> (i32, i32, i32) {
    %c0_i32 = arith.constant 0 : i32
    %c0_i32_0 = arith.constant 0 : i32
    return %arg0, %c0_i32, %arg1 : i32, i32, i32
  }
  func.func @transform_6(%arg0: i32, %arg1: i32) -> (i32, i32, i32) {
    %c0_i32 = arith.constant 0 : i32
    %c0_i32_0 = arith.constant 0 : i32
    return %arg0, %c0_i32, %arg1 : i32, i32, i32
  }
  func.func @transform_7(%arg0: i32, %arg1: i32) -> (i32, i32, i32, i32) {
    %c0_i32 = arith.constant 0 : i32
    %c0_i32_0 = arith.constant 0 : i32
    %c0_i32_1 = arith.constant 0 : i32
    return %arg0, %arg1, %c0_i32, %c0_i32_0 : i32, i32, i32, i32
  }
}

</mosaic_0001>

<bundles_post_ra>
// kernel: tpu_custom_call.1
= control target key start
LH: loop header
LB: loop body
LE: loop exit
PB: predicated region body
PF: predicated region fallthrough
CT: control target
= control target key end

     0   :  { %s1475_s0 = inlined_call_operand.vmem [shape: f32[3,2], index: 0, kind: input, shape index: {}]   ;;  %s1476_s1 = inlined_call_operand.hbm [shape: f32[4,4], index: 1, kind: input, shape index: {}]   ;;  %s1477_s2 = inlined_call_operand.hbm [shape: f32[4,4], index: 2, kind: input, shape index: {}]   ;;  %s1478_s3 = inlined_call_operand.vmem [shape: f32[4,1], index: 3, kind: input, shape index: {}]   ;;  %s1479_s4 = inlined_call_operand.vmem [shape: f32[2,4,256], index: 4, kind: input, shape index: {}]   ;;  %s1480_s5 = inlined_call_operand.hbm [shape: f32[2,4,256], index: 5, kind: input, shape index: {}]   ;;  %s1481_s6 = inlined_call_operand.hbm [shape: f32[2,4,256], index: 6, kind: input, shape index: {}]   ;;  %s1482_s7 = inlined_call_operand.hbm [shape: f32[2,1,8,128], index: 7, kind: output, shape index: {}]  }
   0x1   :  { %1490 = sst [smem:[#allocation19_spill]] %s1476_s1 }
   0x2   :  { %1491 = sst [smem:[#allocation20_spill]] %s1480_s5 }
   0x3   :  { %12 = vsyncpa [#allocation5], 0 }
   0x4   :  { %13 = vsyncpa [#allocation3], 0 }
   0x5   :  { %14 = vsyncpa [#allocation8], 0 }
   0x6   :  { %15 = vsyncpa [#allocation4], 0 }
   0x7   :  { %17 = vsyncpa [#allocation4 + $0x1], 0  ;;  %s1231_s24 = smov 0   ;;  %s1233_s25 = smov 0  }
   0x8   :  { %s1235_s26 = smov 0   ;;  %s1237_s27 = smov 0  }
   0x9   :  { %s1239_s28 = smov 0   ;;  %s1241_s29 = smov 0  }
   0xa LB: > { %s1262_s30 = sadd.s32 4294967295, %s1181_s29   ;;  %s818_s8 = sadd.s32 4294967294, %s1181_s29   ;;  %s1181_s29 = sphi %s1241_s29, %s23_s29   ;;  %s1177_s28 = sphi %s1239_s28, %s1523_s28   ;;  %s1173_s27 = sphi %s1237_s27, %s1522_s27   ;;  %s1169_s26 = sphi %s1235_s26, %s1521_s26   ;;  %s1165_s25 = sphi %s1233_s25, %s1520_s25   ;;  %s1161_s24 = sphi %s1231_s24, %s1519_s24  }
   0xb   : > { %p169_p0 = scmp.ne.s32.totalorder %s1165_s25, %s1161_s24  ;;  %p1484_p1 = scmp.eq.s32.totalorder %s1262_s30, 0 }
   0xc   : > { %p229_p3 = scmp.eq.s32.totalorder %s818_s8, 1  ;;  %p819_p5 = scmp.ge.s32.totalorder %s1181_s29, 1 }
   0xd   : > { %p1271_p4 = por %p1484_p1, %p169_p0  ;;  %p236_p7 = scmp.lt.s32.totalorder %s1181_s29, 3 }
   0xe   : > { %p1276_p6 = por %p229_p3, %p169_p0  ;;  %s1183_s12 = smov [#allocation6]  }
   0xf   : > { %p1281_p8 = pnand %p819_p5, %p236_p7  ;;  %s260_s13 = sshll.u32 %s1183_s12, 4  ;;  %s261_s13 = int_to_ptr.vmem [resolvable:$true] %s260_s13 }
  0x10   : > { %s1493_s10 = scalar_select %p1276_p6, 1, 0 }
  0x11   : > { %p878_p10 = pneg %p1281_p8  ;;  %s35_s15 = sadd.s32 1, %s1177_s28 }
  0x12   : > { %s156_s16 = sadd.s32 1, %s1169_s26  ;;  %p37_p12 = scmp.ge.s32.totalorder %s35_s15, 2 }
  0x13   : > { %p1290_p11 = pnand %p878_p10, %p1484_p1  ;;  %s977_s17 = scalar_lea.vmem %s261_s13, 64 }
  0x14   : > { %p978_p0 = scmp.ne.s32.totalorder %s261_s13, %s977_s17  ;;  %p985_p7 = scmp.lt.s32.totalorder %s261_s13, %s261_s13 }
  0x15   : > { %p1485_p13 = pneg %p1290_p11  ;;  %p986_p9 = scmp.lt.s32.totalorder %s977_s17, %s977_s17 }
  0x17   : > { %p980_p3 = pnand %p978_p0, %p1485_p13  ;;  %p987_p2 = por %p986_p9, %p985_p7 }
  0x19   : > { %p981_p5 = pneg %p980_p3 }
  0x1b   : > { %p988_p10 = pnand %p987_p2, %p981_p5 }
  0x1d   : > { %991 = shalt.err (!%p988_p10)
}
  0x1e   : > { %s1496_s1 = sld [smem:[#allocation19_spill]]  ;;  %s1525_s15 = smov (%p37_p12, %s35_s15), 0 }
  0x1f   : > { %1497 = sst [smem:[#allocation17_spill]] %s1525_s15  ;;  %p163_p2 = scmp.ne.s32.totalorder %s1169_s26, %s1165_s25 }
  0x20   : > { %p164_p9 = scmp.eq.s32.totalorder %s1181_s29, 0  ;;  %s151_s20 = ssub.s32 %s1177_s28, %s1525_s15 }
  0x21   : > { %p902_p0 = scmp.lt.s32.totalorder %s1181_s29, 2  ;;  %p154_p3 = scmp.eq.s32.totalorder %s151_s20, 0 }
  0x22   : > { %p165_p5 = por %p164_p9, %p163_p2  ;;  %p1498_p7 = scmp.eq.s32.totalorder %s1262_s30, 1 }
  0x23   : > { %s298_s22 = sand.u32 1, %s1181_s29   ;;  %s300_s8 = sand.u32 1, %s1169_s26  }
  0x24   : > { %884 = dma.hbm_to_vmem [thread:$0]  (!%p1290_p11), %s1496_s1, 64, %s261_s13, [#allocation3]  }
  0x25   : > { %p1316_p10 = por %p1498_p7, %p163_p2  ;;  %s1325_s12 = sshll.u32 %s300_s8, 3 }
  0x26   : > { %s1322_s23 = scalar_select %p154_p3, %s1169_s26, %s156_s16  }
  0x27   : > { %s1499_s21 = scalar_select %p1316_p10, 1, 0 }
  0x28   : > { %1500 = sst [smem:[#allocation18_spill]] %s1322_s23  ;;  %s1486_s13 = sshll.u32 %s1177_s28, 7 }
  0x29   : > { %s1501_s5 = sld [smem:[#allocation20_spill]]  ;;  %s302_s20 = scalar_lea.vmem [#allocation9], %s1325_s12 }
  0x2a   : > { %s312_s1 = sshll.u32 %s302_s20, 4  ;;  %p1334_p12 = pnand %p902_p0, %p165_p5  ;;  %s313_s1 = int_to_ptr.vmem [resolvable:$true] %s312_s1 }
  0x2b   : > { %s1338_s16 = scalar_lea.sflag [#allocation3], %s298_s22  ;;  %s1005_s8 = scalar_lea.vmem %s313_s1, 128 }
  0x2c   : > { %p1487_p2 = pneg %p1334_p12  ;;  %p1006_p9 = scmp.ne.s32.totalorder %s313_s1, %s1005_s8 }
  0x2d   : > { %s1184_s17 = smov [#allocation9]  }
  0x2e   : > { %p1008_p3 = pnand %p1006_p9, %p1487_p2  ;;  %s1010_s18 = sshll.u32 %s1184_s17, 4  ;;  %s1011_s18 = int_to_ptr.vmem [resolvable:$false] %s1010_s18 }
  0x2f   : > { %s310_s19 = scalar_lea.hbm %s1501_s5, %s1486_s13  ;;  %s1012_s20 = scalar_lea.vmem %s1011_s18, 256 }
  0x30   : > { %p1009_p7 = pneg %p1008_p3  ;;  %p1013_p0 = scmp.lt.s32.totalorder %s313_s1, %s1011_s18 }
  0x31   : > { %p1014_p5 = scmp.lt.s32.totalorder %s1012_s20, %s1005_s8 }
  0x33   : > { %p1015_p1 = por %p1014_p5, %p1013_p0 }
  0x35   : > { %p1016_p13 = pnand %p1015_p1, %p1009_p7 }
  0x37   : > { %1019 = shalt.err (!%p1016_p13)
}
  0x38   : > { %891 = dma.hbm_to_vmem [thread:$0]  (!%p1334_p12), %s310_s19, 128, %s313_s1, %s1338_s16  }
  0x39   : > { %s249_s5 = sshll.u32 %s1475_s0, 4  ;;  %p1503_p3 = pneg %p1290_p11  ;;  %s250_s5 = int_to_ptr.vmem [resolvable:$true] %s249_s5 }
  0x3a   : > { %s1020_s23 = scalar_lea.vmem %s250_s5, 64  ;;  %p1028_p10 = scmp.lt.s32.totalorder %s250_s5, %s250_s5 }
  0x3b   : > { %p1021_p9 = scmp.ne.s32.totalorder %s250_s5, %s1020_s23  ;;  %p1029_p0 = scmp.lt.s32.totalorder %s1020_s23, %s1020_s23 }
  0x3d   : > { %p1023_p2 = pnand %p1021_p9, %p1503_p3  ;;  %p1030_p1 = por %p1029_p0, %p1028_p10 }
  0x3f   : > { %p1024_p6 = pneg %p1023_p2 }
  0x41   : > { %p1031_p13 = pnand %p1030_p1, %p1024_p6 }
  0x43   : > { %1034 = shalt.err (!%p1031_p13)
}
  0x44   : > { %s1185_s8 = smov [#allocation2]   ;;  %s1186_s1 = smov [#allocation7]  }
  0x45   : > { %881 = dma.vmem_to_smem (!%p1290_p11), %s250_s5, 64, %s1185_s8, [#allocation5]  }
  0x46   : > { %s271_s13 = sshll.u32 %s1186_s1, 4  ;;  %s1504_s19 = sshll.u32 %s1177_s28, 7  ;;  %s272_s13 = int_to_ptr.vmem [resolvable:$true] %s271_s13 }
  0x47   : > { %s331_s20 = scalar_lea.hbm %s1481_s6, %s1504_s19  ;;  %s1046_s22 = scalar_lea.vmem %s272_s13, 64 }
  0x48   : > { %p1047_p2 = scmp.ne.s32.totalorder %s272_s13, %s1046_s22  ;;  %p1505_p10 = pmov %p1503_p3 }
  0x49   : > { %p1054_p5 = scmp.lt.s32.totalorder %s272_s13, %s272_s13  ;;  %p1055_p9 = scmp.lt.s32.totalorder %s1046_s22, %s1046_s22 }
  0x4a   : > { %p1049_p6 = pnand %p1047_p2, %p1505_p10 }
  0x4b   : > { %p1056_p3 = por %p1055_p9, %p1054_p5 }
  0x4c   : > { %p1050_p7 = pneg %p1049_p6 }
  0x4e   : > { %p1057_p0 = pnand %p1056_p3, %p1050_p7 }
  0x50   : > { %1060 = shalt.err (!%p1057_p0)
}
  0x51   : > { %887 = dma.hbm_to_vmem [thread:$0]  (!%p1290_p11), %s1477_s2, 64, %s272_s13, [#allocation8]  }
  0x52   : > { %s323_s8 = scalar_lea.vmem [#allocation10], %s1325_s12  ;;  %p1506_p13 = pneg %p1334_p12 }
  0x53   : > { %s333_s1 = sshll.u32 %s323_s8, 4  ;;  %s1187_s17 = smov [#allocation10]   ;;  %s334_s1 = int_to_ptr.vmem [resolvable:$true] %s333_s1 }
  0x54   : > { %s1074_s19 = scalar_lea.vmem %s334_s1, 128  ;;  %s1079_s18 = sshll.u32 %s1187_s17, 4  ;;  %s1080_s18 = int_to_ptr.vmem [resolvable:$false] %s1079_s18 }
  0x55   : > { %p1075_p1 = scmp.ne.s32.totalorder %s334_s1, %s1074_s19  ;;  %s1081_s22 = scalar_lea.vmem %s1080_s18, 256 }
  0x56   : > { %p1082_p6 = scmp.lt.s32.totalorder %s334_s1, %s1080_s18  ;;  %p1083_p7 = scmp.lt.s32.totalorder %s1081_s22, %s1074_s19 }
  0x57   : > { %p1077_p2 = pnand %p1075_p1, %p1506_p13 }
  0x58   : > { %p1084_p5 = por %p1083_p7, %p1082_p6 }
  0x59   : > { %p1078_p10 = pneg %p1077_p2 }
  0x5b   : > { %p1085_p9 = pnand %p1084_p5, %p1078_p10 }
  0x5d   : > { %1088 = shalt.err (!%p1085_p9)
}
  0x5e   : > { %894 = dma.hbm_to_vmem [thread:$0]  (!%p1334_p12), %s331_s20, 128, %s334_s1, %s1338_s16  }
  0x5f   : > { %342 = sbr.rel (%p1281_p8) target bundleno = 575 (0x23f), region = 48  ;;  %p1507_p11 = scmp.eq.s32.totalorder (!%p1281_p8), %s1262_s30, 0 }
  0x64   : > { %1140 = dma.done.wait (%p1507_p11), [#allocation5], 64   ;;  %p1508_p3 = pmov %p1507_p11 }
  0x66   : > { %1142 = vsyncadd (%p1508_p3), [#allocation5], 4294967232  ;;  %p1509_p0 = pmov %p1508_p3 }
  0x68   : > { %1144 = dma.done.wait (%p1509_p0), [#allocation3], 64   ;;  %p1510_p1 = pmov %p1509_p0 }
  0x69   : > { %p1511_p13 = pmov %p1509_p0 }
  0x6a   : > { %1146 = vsyncadd (%p1510_p1), [#allocation3], 4294967232 }
  0x6b   : > { %1148 = dma.done.wait (%p1511_p13), [#allocation8], 64   ;;  %p1512_p12 = pmov %p1509_p0 }
  0x6c   : > { %s356_s11 = sand.u32 1, %s1262_s30   ;;  %s1489_s14 = sand.u32 1, %s1165_s25  }
  0x6d   : > { %1150 = vsyncadd (%p1512_p12), [#allocation8], 4294967232  ;;  %s1394_s15 = sshll.u32 %s1489_s14, 3  ;;  %s357_s12 = scalar_lea.sflag [#allocation3], %s356_s11 }
  0x6e   : > { %s360_s16 = scalar_lea.vmem [#allocation9], %s1394_s15 }
  0x6f   : > { %1152 = dma.done.wait (%p1271_p4), %s357_s12, 256  }
  0x70   : > { %1154 = vsyncadd (%p1271_p4), %s357_s12, 4294967040  ;;  %s369_s13 = scalar_lea.vmem [#allocation10], %s1394_s15 }
  0x71   : > { %374 = sfence }
  0x72   : > { %p416_p8 = scmp.lt.s32.totalorder %s1173_s27, 1  ;;  %s427_s30 = sld [smem:[#allocation2 + %s1173_s27]]  ;;  %v1188_v0 = vmov 0.0   ;;  %v1189_v1 = vmov 0   ;;  %v612_v2 = vld [vmem:[%s1478_s3] sm:$0xf] }
  0x73   : > { %605 = vmatprep.mubr.f32.mxu1 %v1188_v0  ;;  %s428_s20 = sshra.s32 %s1173_s27, 7  ;;  %s433_s5 = sand.u32 127, %s1173_s27  ;;  %525 = vmatprep.mubr.f32.mxu0 %v1188_v0  ;;  %vm456_vm0 = vcmask 1043456   ;;  %v441_v5 = vld [vmem:[%s360_s16] sm:$0xff]  ;;  %v448_v7 = vld [vmem:[#allocation6] sm:$0xf] }
  0x74   : > { %s417_s23 = scalar_select %p416_p8, %s1173_s27, 1  ;;  %960 = vset.pattern.permute.xlu0 %v1189_v1  ;;  %vm452_vm1 = vcmask 31744   ;;  %v442_v8 = vld [vmem:[%s369_s13] sm:$0xff] }
  0x75   : > { %s1410_s1 = sshll.u32 %s428_s20, 7  ;;  %615 = vperm.xlu0 %960, %v612_v2   ;;  %v449_v14 = vld [vmem:[#allocation7] sm:$0xf]  ;;  %p1514_p2 = scmp.ne.s32.totalorder %s1499_s21, 0 }
  0x76   : > { %s853_s19 = sshll.u32 %s417_s23, 3  ;;  %s855_s17 = sadd.s32 128, %s1410_s1 }
  0x77   : > { %s423_s11 = scalar_lea.vmem %s1479_s4, %s853_s19  ;;  %s434_s12 = sadd.s32 %s855_s17, %s433_s5 }
  0x78   : > { %v440_v3 = vld [vmem:[%s423_s11] sm:$0xff]  ;;  %s435_s14 = sld [smem:[#allocation2 + %s434_s12]]  ;;  %v443_v6 = vstv %s427_s30  ;;  %s857_s16 = sadd.s32 256, %s1410_s1 }
  0x79   : > { %v533_v4 = vcombine.high %v440_v3, %v440_v3  ;;  %v444_v9 = vmul.f32 %v443_v6, %v441_v5  ;;  %s438_s30 = sadd.s32 %s857_s16, %s433_s5  ;;  %s848_s5 = sshll.u32 %s1173_s27, 7 }
  0x7a   : > { %s439_s20 = sld [smem:[#allocation2 + %s438_s30]]  ;;  %s661_s1 = scalar_lea.hbm %s1482_s7, %s848_s5 }
  0x7b   : > { %844 = vmatprep.subr.msk.mxu1 %vm456_vm0, %v533_v4  ;;  %s1513_s19 = sand.u32 1, %s1165_s25   ;;  %s1190_s27 = smov [#allocation11]  }
  0x7c   : > { %845 = vmatpush1.msk.msra.mxu1 %vm456_vm0, %v440_v3  ;;  %s649_s17 = scalar_lea.sflag [#allocation4], %s1513_s19 }
  0x7d   : > { %846 = vmatmul.mubr.msk.f32.vlgmr.msra.gmra.mxu1 %vm452_vm1, %v448_v7 }
  0x7e   : > { %v445_v10 = vstv %s435_s14  ;;  %s414_s14 = scalar_lea.vmem [#allocation11], %s1394_s15  ;;  %s1093_s15 = sshll.u32 %s1190_s27, 4  ;;  %s1094_s15 = int_to_ptr.vmem [resolvable:$false] %s1093_s15 }
  0x7f   : > { %v446_v11 = vmul.f32 %v445_v10, %v442_v8  ;;  %s663_s13 = sshll.u32 %s414_s14, 4  ;;  %s1095_s22 = scalar_lea.vmem %s1094_s15, 256  ;;  %s1429_s13 = int_to_ptr.vmem [resolvable:$true] %s663_s13 }
  0x80   : > { %v620_v20 = vstv %s439_s20  ;;  %s1089_s18 = scalar_lea.vmem %s1429_s13, 128  ;;  %p1096_p7 = scmp.lt.s32.totalorder %s1429_s13, %s1094_s15 }
  0x81   : > { %v447_v12 = vadd.f32 %v446_v11, %v444_v9  ;;  %p1090_p4 = scmp.ne.s32.totalorder %s1429_s13, %s1089_s18  ;;  %p1097_p5 = scmp.lt.s32.totalorder %s1095_s22, %s1089_s18 }
  0x83   : > { %v451_v13 = vcombine.high %v447_v12, %v447_v12  ;;  %p1091_p10 = pnand %p1090_p4, %p1514_p2  ;;  %p1098_p9 = por %p1097_p5, %p1096_p7 }
  0x85   : > { %841 = vmatprep.subr.msk.mxu0 %vm456_vm0, %v451_v13  ;;  %p1092_p6 = pneg %p1091_p10 }
  0x86   : > { %842 = vmatpush1.msk.msra.mxu0 %vm456_vm0, %v447_v12 }
  0x87   : > { %843 = vmatmul.mubr.msk.f32.vlgmr.msra.gmra.mxu0 %vm452_vm1, %v449_v14  ;;  %p1099_p11 = pnand %p1098_p9, %p1092_p6 }
  0xf0   : > { %v616_v17 = vpop.permute.xlu0 %615 }
 0x13d   : > { %v607_v15 = vpop.f32.mrf.mxu1 }
 0x13f   : > { %v609_v19 = vpop.f32.mrf.mxu1 }
 0x147   : > { %v527_v16 = vpop.f32.mrf.mxu0 }
 0x148   : > { %v608_v18 = vadd.f32 %v607_v15, %v527_v16 }
 0x149   : > { %v529_v21 = vpop.f32.mrf.mxu0 }
 0x14a   : > { %v618_v22 = vadd.f32 %v616_v17, %v608_v18  ;;  %v610_v23 = vadd.f32 %v609_v19, %v529_v21 }
 0x14c   : > { %v621_v24 = vadd.f32 %v620_v20, %v618_v22  ;;  %v619_v25 = vadd.f32 %v616_v17, %v610_v23 }
 0x14e   : > { %v622_v26 = vadd.f32 %v620_v20, %v619_v25  ;;  %962 = vtanh.f32 %v621_v24 }
 0x150   : > { %964 = vtanh.f32 %v622_v26 }
 0x15b   : > { %v963_v27 = vpop.eup %962 }
 0x15d   : > { %v965_v28 = vpop.eup %964 }
 0x15e   : > { %v627_v29 = vcombine.low %v963_v27, %v965_v28 }
 0x160   : > { %v629_v30 = vsub.f32 %v442_v8, %v627_v29 }
 0x162   : > { %v630_v31 = vand.u32 2147483647, %v629_v30 }
 0x164   : > { %v632_v32 = vcombine.high %v630_v31, %v630_v31  ;;  %v634_v33 = vsel %vm456_vm0, %v630_v31, 0.0 }
 0x166   : > { %v635_v34 = vsel %vm456_vm0, %v632_v32, 0.0 }
 0x167   : > { %v636_v35 = vadd.f32 %v635_v34, %v634_v33 }
 0x169   : > { %637 = vadd.xlane.f32.xlu0 %v636_v35 }
 0x1f2   : > { %v638_v36 = vpop.xlane.xlu0 %637 }
 0x1f3   : > { %v639_v37 = vrot.slane %v638_v36, 4 }
 0x1f5   : > { %v640_v38 = vadd.f32 %v639_v37, %v638_v36 }
 0x1f7   : > { %v641_v39 = vrot.slane %v640_v38, 2 }
 0x1f9   : > { %v642_v40 = vadd.f32 %v641_v39, %v640_v38 }
 0x1fb   : > { %v643_v41 = vrot.slane %v642_v40, 1 }
 0x1fd   : > { %v644_v42 = vadd.f32 %v643_v41, %v642_v40 }
 0x1ff   : > { %858 = vpush %v644_v42 }
 0x230   : > { %s859_s23 = spop %858 }
 0x231   : > { %v646_v43 = vstv %s859_s23 }
 0x232   : > { %647 = vst [vmem:[%s414_s14] sm:$0xff] %v646_v43 }
 0x233   : > { %1102 = shalt.err (!%p1099_p11)
}
 0x234   : > { %s1103_s11 = scalar_lea.hbm %s661_s1, 128  ;;  %s1107_s30 = scalar_lea.hbm %s1482_s7, 256 }
 0x235   : > { %p1104_p3 = scmp.ne.s32.totalorder %s661_s1, %s1103_s11  ;;  %p1108_p13 = scmp.lt.s32.totalorder %s661_s1, %s1482_s7 }
 0x236   : > { %p1109_p12 = scmp.lt.s32.totalorder %s1107_s30, %s1103_s11 }
 0x237   : > { %p1105_p0 = pnand %p1104_p3, %p1514_p2 }
 0x238   : > { %p1110_p8 = por %p1109_p12, %p1108_p13 }
 0x239   : > { %p1106_p1 = pneg %p1105_p0 }
 0x23b   : > { %p1111_p4 = pnand %p1110_p8, %p1106_p1 }
 0x23d   : > { %1114 = shalt.err (!%p1111_p4)
}
 0x23e   : > { %876 = dma.vmem_to_hbm [thread:$0]  (%p1514_p2), %s1429_s13, 128, %s661_s1, %s649_s17  }
 0x23f PF: > { %s675_s5 = sand.u32 1, %s1161_s24   ;;  %p1515_p10 = scmp.ne.s32.totalorder %s1493_s10, 0 }
 0x240   : > { %p1516_p6 = scmp.ge.s32.totalorder %s1181_s29, 2  ;;  %s676_s23 = scalar_lea.sflag [#allocation4], %s675_s5 }
 0x242   : > { %p896_p7 = pnand %p1516_p6, %p1515_p10 }
 0x244   : > { %p897_p5 = pneg %p896_p7 }
 0x246   : > { %1156 = dma.done.wait (%p897_p5), %s676_s23, 128  }
 0x247   : > { %1158 = vsyncadd (%p897_p5), %s676_s23, 4294967168  ;;  %s23_s29 = sadd.s32 1, %s1181_s29   ;;  %s1517_s21 = sld [smem:[#allocation18_spill]] }
 0x248   : > { %p20_p9 = scmp.ge.s32.totalorder %s23_s29, 4   ;;  %s1518_s13 = sld [smem:[#allocation17_spill]] }
 0x249   : > { %s1519_s24 = smov %s1165_s25  ;;  %s1520_s25 = smov %s1169_s26 }
 0x24a   : > { %s1522_s27 = smov %s1177_s28  ;;  %22 = sbr.rel (!%p20_p9) target bundleno = 10 (0xa), region = 119 }
 0x24d   : > { %s1521_s26 = smov %s1517_s21 }
 0x24e   : > { %s1523_s28 = smov %s1518_s13 }
 0x24f   :  { %681 = vsyncpa [#allocation3], 1 }
 0x250   :  { %683 = vsyncpa [#allocation3 + $0x1], 1 }
 0x251   :  { %684 = vsyncpa [#allocation8], 1 }
 0x252   :  { %685 = vsyncpa [#allocation4], 1 }
 0x253   :  { %687 = vsyncpa [#allocation4 + $0x1], 1 }
 0x254   :  { %688 = vsyncpa [#allocation5], 1 }
 0x255   :  { %690 = vsyncpa [#allocation5 + $0x1], 1 }

</bundles_post_ra>
